<compile_context>
chip_gen: v5e
topology: v5e:2x2
jax: 0.10.0
libtpu: 0.0.40
codegen_flags: <defaults>
</compile_context>

<pallas_src>
import functools

import jax
import jax.numpy as jnp
from jax import lax
from jax.experimental import pallas as pl
from jax.experimental.pallas import tpu as pltpu


# ------------------------------ VMEM budgeting -------------------------------

def _vmem_capacity_bytes():
    try:
        cap = getattr(pltpu.get_tpu_info(), "vmem_capacity_bytes", None)
        if cap:
            return int(cap)
    except Exception:
        pass
    return 64 * 1024 * 1024  # v7x per-core VMEM (smallest of v5e/v6e/v7x)


_VMEM_CAP = _vmem_capacity_bytes()
_VMEM_LIMIT = min(int(_VMEM_CAP * 0.8), 110 * 1024 * 1024)
_VMEM_BUDGET = int(_VMEM_CAP * 0.6)


def _round_up(x, m):
    return -(-x // m) * m


def _pick_hw_tile(hwp, col_bytes, fixed_bytes, max_tile=8192):
    """Largest multiple-of-128 divisor of hwp whose working set fits the VMEM budget."""
    best = 128
    t = 128
    while t <= min(hwp, max_tile):
        if hwp % t == 0 and t * col_bytes + fixed_bytes <= _VMEM_BUDGET:
            best = t
        t += 128
    return best


# ----------------------------- Pallas kernels --------------------------------

def _silu(x):
    return x * jax.nn.sigmoid(x)


def _conv1x1_act_kernel(x_ref, w_ref, b_ref, o_ref):
    # x: (Cin, hw) bf16, w: (Cout, Cin) bf16 (BN scale pre-folded), b: (Cout, 1) f32.
    y = jnp.dot(w_ref[...], x_ref[...], preferred_element_type=jnp.float32) + b_ref[...]
    o_ref[...] = _silu(y).astype(o_ref.dtype)


def _conv3x3_bn_silu(x, w_ref, b_ref, row, col, *, H, W):
    # x: (Cin, HWp) bf16 value; w_ref: (9, Cout, Cin) bf16 (BN scale folded);
    # b_ref: (Cout, 1) f32; row/col: (1, HWp) int32 spatial coordinate of each lane.
    cout = w_ref.shape[1]
    hwp = x.shape[1]
    acc = jnp.zeros((cout, hwp), jnp.float32)
    for ky in range(3):
        for kx in range(3):
            dy, dx = ky - 1, kx - 1
            s = dy * W + dx
            xs = x if s == 0 else jnp.roll(x, -s, axis=1)
            valid = ((row + dy >= 0) & (row + dy < H) &
                     (col + dx >= 0) & (col + dx < W))
            xs = jnp.where(valid, xs, jnp.zeros_like(xs))
            acc = acc + jnp.dot(w_ref[ky * 3 + kx], xs,
                                preferred_element_type=jnp.float32)
    return _silu(acc + b_ref[...])


def _bottleneck_kernel(y_ref, rc_ref, w1_ref, b1_ref, w2_ref, b2_ref, o_ref, *,
                       H, W, shortcut):
    # Whole Bottleneck (3x3 conv+BN+SiLU, 3x3 conv+BN+SiLU, residual) on one batch element.
    y = y_ref[...]
    row = rc_ref[0:1, :]
    col = rc_ref[1:2, :]
    t = _conv3x3_bn_silu(y, w1_ref, b1_ref, row, col, H=H, W=W).astype(y.dtype)
    z = _conv3x3_bn_silu(t, w2_ref, b2_ref, row, col, H=H, W=W)
    if shortcut:
        z = z + y.astype(jnp.float32)
    o_ref[...] = z.astype(o_ref.dtype)


def _csp_tail_kernel(y_ref, x_ref, w3_ref, b3_ref, w2_ref, b2_ref,
                     w4a_ref, w4b_ref, b4_ref, o_ref):
    # z1 = SiLU(BN(cv3@y)); z2 = SiLU(BN(cv2@x)); out = SiLU(BN(cv4 @ concat(z1, z2))).
    # BN scales are pre-folded into w3/w2/w4; cv4 is split over the concat halves.
    z1 = _silu(jnp.dot(w3_ref[...], y_ref[...],
                       preferred_element_type=jnp.float32) + b3_ref[...])
    z2 = _silu(jnp.dot(w2_ref[...], x_ref[...],
                       preferred_element_type=jnp.float32) + b2_ref[...])
    acc = jnp.dot(w4a_ref[...], z1.astype(w4a_ref.dtype),
                  preferred_element_type=jnp.float32)
    acc = acc + jnp.dot(w4b_ref[...], z2.astype(w4b_ref.dtype),
                        preferred_element_type=jnp.float32)
    o_ref[...] = _silu(acc + b4_ref[...]).astype(o_ref.dtype)


# ------------------------------- Wrappers -------------------------------------

def _conv1x1_act(x, w, bias):
    N, cin, hwp = x.shape
    cout = w.shape[0]
    col_bytes = 2 * 2 * (cin + cout)                       # bf16 in/out, double-buffered
    fixed = 2 * (cout * cin * 2 + cout * 4)
    hw_t = _pick_hw_tile(hwp, col_bytes, fixed)
    return pl.pallas_call(
        _conv1x1_act_kernel,
        grid=(N, hwp // hw_t),
        in_specs=[pl.BlockSpec((None, cin, hw_t), lambda b, j: (b, 0, j)),
                  pl.BlockSpec((cout, cin), lambda b, j: (0, 0)),
                  pl.BlockSpec((cout, 1), lambda b, j: (0, 0))],
        out_specs=pl.BlockSpec((None, cout, hw_t), lambda b, j: (b, 0, j)),
        out_shape=jax.ShapeDtypeStruct((N, cout, hwp), jnp.bfloat16),
        compiler_params=pltpu.CompilerParams(
            dimension_semantics=("parallel", "parallel"),
            vmem_limit_bytes=_VMEM_LIMIT),
    )(x, w, bias.reshape(cout, 1).astype(jnp.float32))


def _bottleneck(y, rc, w1, b1, w2, b2, *, H, W, shortcut):
    N, c_, hwp = y.shape
    kernel = functools.partial(_bottleneck_kernel, H=H, W=W, shortcut=shortcut)
    # TODO(synk): for feature maps too large for VMEM (c_*HWp bf16 >> budget) this needs
    # spatial tiling with a 1-row halo; typical YOLO CSP stage sizes fit comfortably.
    return pl.pallas_call(
        kernel,
        grid=(N,),
        in_specs=[pl.BlockSpec((None, c_, hwp), lambda b: (b, 0, 0)),
                  pl.BlockSpec((2, hwp), lambda b: (0, 0)),
                  pl.BlockSpec((9, c_, c_), lambda b: (0, 0, 0)),
                  pl.BlockSpec((c_, 1), lambda b: (0, 0)),
                  pl.BlockSpec((9, c_, c_), lambda b: (0, 0, 0)),
                  pl.BlockSpec((c_, 1), lambda b: (0, 0))],
        out_specs=pl.BlockSpec((None, c_, hwp), lambda b: (b, 0, 0)),
        out_shape=jax.ShapeDtypeStruct((N, c_, hwp), jnp.bfloat16),
        compiler_params=pltpu.CompilerParams(
            dimension_semantics=("parallel",),
            vmem_limit_bytes=_VMEM_LIMIT),
    )(y, rc, w1, b1.reshape(c_, 1).astype(jnp.float32),
      w2, b2.reshape(c_, 1).astype(jnp.float32))


def _csp_tail(y, x, w3, b3, w2, b2, w4a, w4b, b4):
    N, c_, hwp = y.shape
    cin = x.shape[1]
    c2 = w4a.shape[0]
    col_bytes = 2 * 2 * (c_ + cin + c2) + 4 * 2 * c_       # bf16 tiles (dbl-buf) + f32 z1/z2
    fixed = 2 * 2 * (w3.size + w2.size + w4a.size + w4b.size) + 4 * (2 * c_ + c2)
    hw_t = _pick_hw_tile(hwp, col_bytes, fixed)
    return pl.pallas_call(
        _csp_tail_kernel,
        grid=(N, hwp // hw_t),
        in_specs=[pl.BlockSpec((None, c_, hw_t), lambda b, j: (b, 0, j)),
                  pl.BlockSpec((None, cin, hw_t), lambda b, j: (b, 0, j)),
                  pl.BlockSpec((c_, c_), lambda b, j: (0, 0)),
                  pl.BlockSpec((c_, 1), lambda b, j: (0, 0)),
                  pl.BlockSpec((c_, cin), lambda b, j: (0, 0)),
                  pl.BlockSpec((c_, 1), lambda b, j: (0, 0)),
                  pl.BlockSpec((c2, c_), lambda b, j: (0, 0)),
                  pl.BlockSpec((c2, c_), lambda b, j: (0, 0)),
                  pl.BlockSpec((c2, 1), lambda b, j: (0, 0))],
        out_specs=pl.BlockSpec((None, c2, hw_t), lambda b, j: (b, 0, j)),
        out_shape=jax.ShapeDtypeStruct((N, c2, hwp), jnp.bfloat16),
        compiler_params=pltpu.CompilerParams(
            dimension_semantics=("parallel", "parallel"),
            vmem_limit_bytes=_VMEM_LIMIT),
    )(y, x, w3, b3.reshape(c_, 1).astype(jnp.float32),
      w2, b2.reshape(c_, 1).astype(jnp.float32),
      w4a, w4b, b4.reshape(c2, 1).astype(jnp.float32))


# ------------------------- parameter folding helpers ---------------------------

def _bn_fold(gamma, beta, mean, var, eps=1e-5):
    scale = gamma / jnp.sqrt(var + eps)
    return scale, beta - mean * scale


def _fold_w1x1(w, scale):
    # (Cout, Cin, 1, 1) -> (Cout, Cin), BN scale folded, bf16.
    cout, cin = w.shape[:2]
    return (w.reshape(cout, cin) * scale[:, None]).astype(jnp.bfloat16)


def _fold_w3x3(w, scale):
    # (Cout, Cin, 3, 3) -> (9, Cout, Cin), tap index t = ky*3 + kx, BN scale folded, bf16.
    cout, cin = w.shape[:2]
    wt = (w * scale[:, None, None, None]).transpose(2, 3, 0, 1).reshape(9, cout, cin)
    return wt.astype(jnp.bfloat16)


# --------------------------- BottleneckCSP forward ----------------------------

def bottleneck_csp_forward(x, p, *, shortcut=True, g=1):
    # TODO(synk): grouped 3x3 conv (g > 1) in Bottleneck.cv2 not implemented in the Pallas path.
    assert g == 1
    N, c1, H, W = x.shape
    hw = H * W
    hwp = _round_up(hw, 128)
    c_ = p["cv1_w"].shape[0]
    c2 = p["cv4_w"].shape[0]

    xf = x.reshape(N, c1, hw).astype(jnp.bfloat16)
    if hwp != hw:
        xf = jnp.pad(xf, ((0, 0), (0, 0), (0, hwp - hw)))

    # Per-lane spatial coordinates for the in-kernel 3x3 border masks.
    pos = jnp.arange(hwp, dtype=jnp.int32)
    rc = jnp.stack([pos // W, pos % W], axis=0)            # (2, hwp) int32

    # cv1: 1x1 conv + BN + SiLU (scale folded into weights).
    s1, b1 = _bn_fold(*p["cv1_bn"])
    y = _conv1x1_act(xf, _fold_w1x1(p["cv1_w"], s1), b1)

    # m: n x Bottleneck(c_, c_, shortcut, e=1.0) — one fused kernel per Bottleneck.
    for blk in p["m"]:
        sA, bA = _bn_fold(*blk["cv1_bn"])
        sB, bB = _bn_fold(*blk["cv2_bn"])
        y = _bottleneck(y, rc,
                        _fold_w3x3(blk["cv1_w"], sA), bA,
                        _fold_w3x3(blk["cv2_w"], sB), bB,
                        H=H, W=W, shortcut=shortcut)

    # Fused tail: cv3 / cv2 / mid-BN / SiLU / concat / cv4 / BN / SiLU in one kernel.
    s_mid, b_mid = _bn_fold(*p["bn"])
    s4, b4 = _bn_fold(*p["cv4_bn"])
    w3 = _fold_w1x1(p["cv3_w"], s_mid[:c_])
    w2 = _fold_w1x1(p["cv2_w"], s_mid[c_:])
    w4 = p["cv4_w"].reshape(c2, 2 * c_) * s4[:, None]
    out = _csp_tail(y, xf, w3, b_mid[:c_], w2, b_mid[c_:],
                    w4[:, :c_].astype(jnp.bfloat16),
                    w4[:, c_:].astype(jnp.bfloat16), b4)

    out = out[:, :, :hw].reshape(N, c2, H, W)
    return out.astype(x.dtype)


# ----------------------------- Pure-JAX reference ------------------------------

def _conv2d_ref(x, w, padding=0):
    return lax.conv_general_dilated(
        x, w, window_strides=(1, 1),
        padding=[(padding, padding), (padding, padding)],
        dimension_numbers=("NCHW", "OIHW", "NCHW"),
        precision=lax.Precision.HIGHEST)


def _bn_ref(x, gamma, beta, mean, var, eps=1e-5):
    s = gamma / jnp.sqrt(var + eps)
    b = beta - mean * s
    return x * s[None, :, None, None] + b[None, :, None, None]


def _conv_block_ref(x, w, bn_params):
    k = w.shape[-1]
    return _silu(_bn_ref(_conv2d_ref(x, w, padding=(k - 1) // 2), *bn_params))


def bottleneck_csp_ref(x, p, *, shortcut=True):
    y = _conv_block_ref(x, p["cv1_w"], p["cv1_bn"])
    for blk in p["m"]:
        t = _conv_block_ref(y, blk["cv1_w"], blk["cv1_bn"])
        t = _conv_block_ref(t, blk["cv2_w"], blk["cv2_bn"])
        y = y + t if shortcut else t
    y1 = _conv2d_ref(y, p["cv3_w"])
    y2 = _conv2d_ref(x, p["cv2_w"])
    z = _silu(_bn_ref(jnp.concatenate([y1, y2], axis=1), *p["bn"]))
    return _conv_block_ref(z, p["cv4_w"], p["cv4_bn"])


# ------------------------------------ test -------------------------------------

def _make_bn(key, c):
    k1, k2, k3, k4 = jax.random.split(key, 4)
    gamma = jax.random.uniform(k1, (c,), jnp.float32, 0.5, 1.5)
    beta = 0.1 * jax.random.normal(k2, (c,), jnp.float32)
    mean = 0.1 * jax.random.normal(k3, (c,), jnp.float32)
    var = jax.random.uniform(k4, (c,), jnp.float32, 0.5, 1.5)
    return (gamma, beta, mean, var)


def _make_conv_w(key, cout, cin, k):
    fan = cin * k * k
    return jax.random.normal(key, (cout, cin, k, k), jnp.float32) / jnp.sqrt(float(fan))


if __name__ == "__main__":
    key = jax.random.PRNGKey(0)
    c1, c2_out, n, shortcut, g, e = 4, 4, 1, True, 1, 0.5
    c_ = int(c2_out * e)
    N, H, W = 2, 16, 16

    keys = jax.random.split(key, 12)
    params = {
        "cv1_w": _make_conv_w(keys[0], c_, c1, 1),
        "cv1_bn": _make_bn(keys[1], c_),
        "cv2_w": _make_conv_w(keys[2], c_, c1, 1),
        "cv3_w": _make_conv_w(keys[3], c_, c_, 1),
        "cv4_w": _make_conv_w(keys[4], c2_out, 2 * c_, 1),
        "cv4_bn": _make_bn(keys[5], c2_out),
        "bn": _make_bn(keys[6], 2 * c_),
        "m": [
            {
                "cv1_w": _make_conv_w(keys[7], c_, c_, 3),
                "cv1_bn": _make_bn(keys[8], c_),
                "cv2_w": _make_conv_w(keys[9], c_, c_, 3),
                "cv2_bn": _make_bn(keys[10], c_),
            }
            for _ in range(n)
        ],
    }
    x = jax.random.normal(keys[11], (N, c1, H, W), jnp.float32)

    out = bottleneck_csp_forward(x, params, shortcut=shortcut, g=g)
    out = jax.block_until_ready(out)
    ref = bottleneck_csp_ref(x, params, shortcut=shortcut)

    # bf16 activations/weights (f32 accumulation) vs f32 HIGHEST reference -> loosened tolerance.
    ok = (out.shape == (N, c2_out, H, W)) and bool(
        jnp.allclose(out.astype(jnp.float32), ref, atol=5e-2, rtol=5e-2))
    print("KERNEL_OK" if ok else "KERNEL_MISMATCH")
</pallas_src>

<mosaic_0001>
module attributes {stable_mosaic.version = 11 : i64} {
  func.func @_conv1x1_act_kernel(%arg0: i32, %arg1: i32, %arg2: memref<1x4x256xbf16, #tpu.memory_space<vmem>>, %arg3: memref<2x4xbf16, #tpu.memory_space<vmem>>, %arg4: memref<2x1xf32, #tpu.memory_space<vmem>>, %arg5: memref<1x2x256xbf16, #tpu.memory_space<vmem>>) attributes {dimension_semantics = [#tpu.dimension_semantics<parallel>, #tpu.dimension_semantics<parallel>], iteration_bounds = array<i64: 2, 1>, scalar_prefetch = 0 : i64, scratch_operands = 0 : i64, tpu.core_type = #tpu.core_type<tc>, window_params = [{transform_indices = @transform_0, window_bounds = array<i64: 1, 4, 256>}, {pipeline_mode = #tpu.pipeline_mode<synchronous>, transform_indices = @transform_1, window_bounds = array<i64: 2, 4>}, {pipeline_mode = #tpu.pipeline_mode<synchronous>, transform_indices = @transform_2, window_bounds = array<i64: 2, 1>}, {transform_indices = @transform_3, window_bounds = array<i64: 1, 2, 256>}]} {
    %c0 = arith.constant 0 : index
    %c0_0 = arith.constant 0 : index
    %0 = vector.load %arg3[%c0, %c0_0] : memref<2x4xbf16, #tpu.memory_space<vmem>>, vector<2x4xbf16>
    %c0_1 = arith.constant 0 : index
    %c0_2 = arith.constant 0 : index
    %c0_3 = arith.constant 0 : index
    %1 = vector.load %arg2[%c0_1, %c0_2, %c0_3] : memref<1x4x256xbf16, #tpu.memory_space<vmem>>, vector<1x4x256xbf16>
    %2 = vector.shape_cast %1 : vector<1x4x256xbf16> to vector<4x256xbf16>
    %cst = arith.constant dense<0.000000e+00> : vector<2x256xf32>
    %3 = tpu.matmul %0, %2, %cst {dimension_numbers = #tpu.dot_dimension_numbers<[1], [0], [0], [1], [0, 0, 1, 1], [], []>} : vector<2x4xbf16>, vector<4x256xbf16>, vector<2x256xf32> -> vector<2x256xf32>
    %c0_4 = arith.constant 0 : index
    %c0_5 = arith.constant 0 : index
    %4 = vector.load %arg4[%c0_4, %c0_5] : memref<2x1xf32, #tpu.memory_space<vmem>>, vector<2x1xf32>
    %5 = vector.broadcast %4 : vector<2x1xf32> to vector<2x256xf32>
    %6 = arith.addf %3, %5 : vector<2x256xf32>
    %7 = arith.negf %6 : vector<2x256xf32>
    %8 = math.exp %7 : vector<2x256xf32>
    %cst_6 = arith.constant 1.000000e+00 : f32
    %9 = vector.broadcast %cst_6 : f32 to vector<2x256xf32>
    %10 = arith.addf %9, %8 : vector<2x256xf32>
    %11 = arith.divf %9, %10 : vector<2x256xf32>
    %12 = arith.mulf %6, %11 : vector<2x256xf32>
    %13 = arith.truncf %12 : vector<2x256xf32> to vector<2x256xbf16>
    %c0_7 = arith.constant 0 : index
    %c0_8 = arith.constant 0 : index
    %c0_9 = arith.constant 0 : index
    %14 = vector.load %arg5[%c0_7, %c0_8, %c0_9] : memref<1x2x256xbf16, #tpu.memory_space<vmem>>, vector<1x2x256xbf16>
    %15 = vector.shape_cast %14 : vector<1x2x256xbf16> to vector<2x256xbf16>
    %16 = vector.shape_cast %13 : vector<2x256xbf16> to vector<1x2x256xbf16>
    tpu.vector_store %arg5[%c0_7, %c0_8, %c0_9], %16 {strides = array<i32>} : memref<1x2x256xbf16, #tpu.memory_space<vmem>>, vector<1x2x256xbf16>,
    return
  }
  func.func @transform_0(%arg0: i32, %arg1: i32) -> (i32, i32, i32) {
    %c0_i32 = arith.constant 0 : i32
    %c0_i32_0 = arith.constant 0 : i32
    return %arg0, %c0_i32, %arg1 : i32, i32, i32
  }
  func.func @transform_1(%arg0: i32, %arg1: i32) -> (i32, i32) {
    %c0_i32 = arith.constant 0 : i32
    %c0_i32_0 = arith.constant 0 : i32
    %c0_i32_1 = arith.constant 0 : i32
    return %c0_i32, %c0_i32_0 : i32, i32
  }
  func.func @transform_2(%arg0: i32, %arg1: i32) -> (i32, i32) {
    %c0_i32 = arith.constant 0 : i32
    %c0_i32_0 = arith.constant 0 : i32
    %c0_i32_1 = arith.constant 0 : i32
    return %c0_i32, %c0_i32_0 : i32, i32
  }
  func.func @transform_3(%arg0: i32, %arg1: i32) -> (i32, i32, i32) {
    %c0_i32 = arith.constant 0 : i32
    %c0_i32_0 = arith.constant 0 : i32
    return %arg0, %c0_i32, %arg1 : i32, i32, i32
  }
}

</mosaic_0001>

<bundles_post_ra>
// kernel: tpu_custom_call.1
= control target key start
LH: loop header
LB: loop body
LE: loop exit
PB: predicated region body
PF: predicated region fallthrough
CT: control target
= control target key end

     0   :  { %8 = vsyncpa [#allocation3], 0  ;;  %s760_s0 = inlined_call_operand.hbm [shape: bf16[2,4,256], index: 0, kind: input, shape index: {}]   ;;  %s761_s1 = inlined_call_operand.vmem [shape: bf16[2,4], index: 1, kind: input, shape index: {}]   ;;  %s762_s2 = inlined_call_operand.vmem [shape: f32[2,1], index: 2, kind: input, shape index: {}]   ;;  %s763_s3 = inlined_call_operand.hbm [shape: bf16[2,2,256], index: 3, kind: output, shape index: {}]  }
   0x1   :  { %10 = vsyncpa [#allocation3 + $0x1], 0 }
   0x2   :  { %11 = vsyncpa [#allocation4], 0 }
   0x3   :  { %13 = vsyncpa [#allocation4 + $0x1], 0  ;;  %s633_s12 = smov 0   ;;  %s635_s13 = smov 0  }
   0x4   :  { %s637_s14 = smov 0   ;;  %s639_s15 = smov 0  }
   0x5   :  { %s641_s16 = smov 0   ;;  %s643_s17 = smov 0  }
   0x6 LB: > { %s407_s18 = sadd.s32 4294967295, %s610_s17   ;;  %s408_s19 = sadd.s32 4294967294, %s610_s17   ;;  %s610_s17 = sphi %s643_s17, %s19_s17   ;;  %s606_s16 = sphi %s641_s16, %s772_s16   ;;  %s602_s15 = sphi %s639_s15, %s771_s15   ;;  %s598_s14 = sphi %s637_s14, %s770_s14   ;;  %s594_s13 = sphi %s635_s13, %s769_s13   ;;  %s590_s12 = sphi %s633_s12, %s768_s12  }
   0x7   : > { %s31_s20 = sadd.s32 1, %s606_s16  ;;  %s40_s21 = sadd.s32 1, %s598_s14 }
   0x8   : > { %p33_p0 = scmp.ge.s32.totalorder %s31_s20, 2  ;;  %p47_p1 = scmp.ne.s32.totalorder %s598_s14, %s594_s13 }
   0x9   : > { %p48_p2 = scmp.eq.s32.totalorder %s610_s17, 0  ;;  %p53_p3 = scmp.ne.s32.totalorder %s594_s13, %s590_s12 }
   0xa   : > { %s774_s20 = smov (%p33_p0, %s31_s20), 0  ;;  %p54_p5 = scmp.eq.s32.totalorder %s407_s18, 0 }
   0xb   : > { %p674_p4 = por %p48_p2, %p47_p1  ;;  %s35_s23 = ssub.s32 %s606_s16, %s774_s20 }
   0xc   : > { %p121_p6 = scmp.eq.s32.totalorder %s407_s18, 1  ;;  %p38_p7 = scmp.eq.s32.totalorder %s35_s23, 0 }
   0xd   : > { %p680_p8 = por %p54_p5, %p53_p3  ;;  %p127_p10 = scmp.eq.s32.totalorder %s408_s19, 1 }
   0xe   : > { %p684_p9 = por %p121_p6, %p47_p1  ;;  %p410_p12 = scmp.ge.s32.totalorder %s610_s17, 2 }
   0xf   : > { %s689_s26 = scalar_select %p38_p7, %s598_s14, %s40_s21  }
  0x10   : > { %p691_p11 = por %p127_p10, %p53_p3  ;;  %p438_p13 = scmp.lt.s32.totalorder %s610_s17, 2 }
  0x11   : > { %s153_s28 = sand.u32 1, %s598_s14   ;;  %s425_s30 = sshll.u32 %s606_s16, 2 }
  0x12   : > { %s411_s29 = sshll.u32 %s153_s28, 2  ;;  %s164_s6 = scalar_lea.hbm %s760_s0, %s425_s30 }
  0x13   : > { %s157_s7 = scalar_lea.vmem [#allocation2], %s411_s29  ;;  %s166_s9 = sshll.u32 %s164_s6, 4  ;;  %s167_s9 = int_to_ptr.hbm [resolvable:$true] %s166_s9 }
  0x14   : > { %s168_s8 = sshll.u32 %s157_s7, 4  ;;  %p431_p0 = pnand %p438_p13, %p674_p4  ;;  %s169_s8 = int_to_ptr.vmem [resolvable:$true] %s168_s8 }
  0x15   : > { %p414_p1 = scmp.ge.s32.totalorder %s610_s17, 1  ;;  %p173_p2 = scmp.lt.s32.totalorder %s610_s17, 3 }
  0x16   : > { %s154_s10 = scalar_lea.sflag [#allocation3], %s153_s28 }
  0x17   : > { %433 = dma.hbm_to_vmem [thread:$0]  (!%p431_p0), %s167_s9, 64, %s169_s8, %s154_s10  }
  0x18   : > { %p174_p3 = pnand %p414_p1, %p173_p2 }
  0x19   : > { %s707_s11 = sand.u32 (!%p174_p3), 1, %s594_s13  }
  0x1a   : > { %177 = sbr.rel (%p174_p3) target bundleno = 212 (0xd4), region = 32  ;;  %s415_s18 = sshll.u32 (!%p174_p3), %s707_s11, 2 }
  0x1b   : > { %s180_s19 = scalar_lea.sflag (!%p174_p3), [#allocation3], %s707_s11  ;;  %s183_s21 = scalar_lea.vmem (!%p174_p3), [#allocation2], %s415_s18 }
  0x1f   : > { %581 = dma.done.wait (%p680_p8), %s180_s19, 64  }
  0x20   : > { %583 = vsyncadd (%p680_p8), %s180_s19, 4294967232  ;;  %v612_v0 = vmov 0   ;;  %v211_v1 = vld [vmem:[%s183_s21] sm:$0xf]  ;;  %v212_v2 = vld [vmem:[%s762_s2] sm:$0x3] }
  0x21   : > { %489 = vset.pattern.permute.xlu0 %v612_v0  ;;  %219 = vst [vmem:[#allocation1] ss:$4 sm:$0xff] %v211_v1  ;;  %vm226_vm0 = vcmask 1041408   ;;  %v210_v7 = vld [vmem:[%s761_s1] sm:$0x1]  ;;  %vm222_vm1 = vcmask 31744  }
  0x22   : > { %215 = vperm.xlu0 %489, %v212_v2   ;;  %s416_s24 = sshll.u32 %s707_s11, 1  ;;  %s422_s30 = sshll.u32 %s602_s15, 1  ;;  %vm300_vm10 = vcmask 1040384  }
  0x23   : > { %s319_s6 = scalar_lea.hbm %s763_s3, %s422_s30  ;;  %s206_s7 = scalar_lea.vmem [#allocation5], %s416_s24 }
  0x24   : > { %s321_s8 = sshll.u32 %s206_s7, 4  ;;  %s323_s15 = sshll.u32 %s319_s6, 4  ;;  %s322_s8 = int_to_ptr.vmem [resolvable:$true] %s321_s8  ;;  %s324_s15 = int_to_ptr.hbm [resolvable:$true] %s323_s15 }
  0x25   : > { %s307_s9 = scalar_lea.sflag [#allocation4], %s707_s11  ;;  %s542_s10 = sshra.s32 %s324_s15, 4  ;;  %s543_s10 = int_to_ptr.hbm [resolvable:$true] %s542_s10 }
  0x26   : > { %s544_s18 = scalar_lea.hbm %s543_s10, 2  ;;  %s548_s22 = scalar_lea.hbm %s763_s3, 4 }
  0x27   : > { %p545_p4 = scmp.ne.s32.totalorder %s543_s10, %s544_s18  ;;  %p549_p7 = scmp.lt.s32.totalorder %s543_s10, %s763_s3 }
  0x28   : > { %v220_v3 = vld.sshfl [vmem:[#allocation1] sm:$0xff pattern:$0x73625140]  ;;  %v221_v4 = vld.sshfl [vmem:[#allocation1 + $0x8] sm:$0xff pattern:$0x73625140]  ;;  %p550_p8 = scmp.lt.s32.totalorder %s548_s22, %s544_s18 }
  0x29   : > { %v227_v5 = vsel %vm226_vm0, %v220_v3, 0  ;;  %v229_v6 = vsel %vm226_vm0, %v221_v4, 0  ;;  %p546_p5 = pnand %p545_p4, %p684_p9 }
  0x2a   : > { %238 = vmatpush.bf16.msra.mxu0 %v227_v5  ;;  %251 = vmatpush.bf16.msra.mxu1 %v229_v6  ;;  %p551_p10 = por %p550_p8, %p549_p7 }
  0x2b   : > { %p547_p6 = pneg %p546_p5 }
  0x2d   : > { %417 = vmatmul.msk.bf16.vlgmr.msra.gmra.mxu0 %vm222_vm1, %v210_v7  ;;  %418 = vmatmul.msk.bf16.vlgmr.msra.gmra.mxu1 %vm222_vm1, %v210_v7  ;;  %p552_p13 = pnand %p551_p10, %p547_p6 }
  0x94   : > { %v216_v8 = vpop.permute.xlu0 %215 }
  0xaa   : > { %v240_v9 = vpop.f32.mrf.mxu0  ;;  %v253_v10 = vpop.f32.mrf.mxu1 }
  0xab   : > { %v241_v11 = vadd.f32 %v240_v9, %v216_v8  ;;  %v254_v12 = vadd.f32 %v253_v10, %v216_v8 }
  0xad   : > { %v419_v13 = vmul.f32 -1.442695, %v241_v11  ;;  %v420_v14 = vmul.f32 -1.442695, %v254_v12 }
  0xaf   : > { %490 = vpow2.f32 %v419_v13 }
  0xb0   : > { %492 = vpow2.f32 %v420_v14 }
  0xb2   : > { %v242_v15 = vpop.f32.mrf.mxu0  ;;  %v255_v16 = vpop.f32.mrf.mxu1 }
  0xb5   : > { %v491_v17 = vpop.eup %490 }
  0xb6   : > { %v493_v18 = vpop.eup %492  ;;  %v263_v19 = vadd.f32 1.0, %v491_v17 }
  0xb7   : > { %v264_v20 = vadd.f32 1.0, %v493_v18 }
  0xb8   : > { %494 = vrcp.f32 %v263_v19  ;;  %v276_v26 = vand.u32 2147483648, %v263_v19  ;;  %v274_v29 = vand.u32 2147483647, %v263_v19  ;;  %vm270_vm4 = vweird.f32 %v263_v19 }
  0xb9   : > { %496 = vrcp.f32 %v264_v20  ;;  %v291_v30 = vand.u32 2147483648, %v264_v20  ;;  %v289_v32 = vand.u32 2147483647, %v264_v20  ;;  %vm285_vm6 = vweird.f32 %v264_v20 }
  0xba   : > { %v277_v34 = vor.u32 1.1754944e-38, %v276_v26  ;;  %vm275_vm7 = vcmp.eq.f32.partialorder %v274_v29, 8.507059e+37 }
  0xbb   : > { %v292_v37 = vor.u32 1.1754944e-38, %v291_v30  ;;  %vm290_vm9 = vcmp.eq.f32.partialorder %v289_v32, 8.507059e+37 }
  0xbe   : > { %v495_v21 = vpop.eup %494 }
  0xbf   : > { %v497_v22 = vpop.eup %496  ;;  %v266_v23 = vmul.f32 %v495_v21, %v263_v19  ;;  %vm271_vm2 = vweird.f32 %v495_v21 }
  0xc0   : > { %v281_v24 = vmul.f32 %v497_v22, %v264_v20  ;;  %vm286_vm3 = vweird.f32 %v497_v22  ;;  %vm272_vm5 = vmor %vm270_vm4, %vm271_vm2 }
  0xc1   : > { %v267_v25 = vsub.f32 1.0, %v266_v23  ;;  %vm287_vm8 = vmor %vm285_vm6, %vm286_vm3 }
  0xc2   : > { %v282_v27 = vsub.f32 1.0, %v281_v24 }
  0xc3   : > { %v268_v28 = vmul.f32 %v495_v21, %v267_v25 }
  0xc4   : > { %v283_v31 = vmul.f32 %v497_v22, %v282_v27 }
  0xc5   : > { %v269_v33 = vadd.f32 %v495_v21, %v268_v28 }
  0xc6   : > { %v284_v35 = vadd.f32 %v497_v22, %v283_v31 }
  0xc7   : > { %v273_v36 = vsel %vm272_vm5, %v495_v21, %v269_v33 }
  0xc8   : > { %v278_v38 = vsel %vm275_vm7, %v277_v34, %v273_v36  ;;  %v288_v39 = vsel %vm287_vm8, %v497_v22, %v284_v35 }
  0xc9   : > { %v295_v40 = vmul.f32 %v278_v38, %v241_v11  ;;  %v293_v41 = vsel %vm290_vm9, %v292_v37, %v288_v39 }
  0xca   : > { %v296_v42 = vmul.f32 %v293_v41, %v254_v12 }
  0xcc   : > { %v297_v43 = vpack.c.bf16 %v296_v42, %v295_v40 }
  0xce   : > { %v299_v44 = vrot.slane %v297_v43, 3 }
  0xd0   : > { %v303_v45 = vsel %vm300_vm10, %v297_v43, %v299_v44 }
  0xd1   : > { %305 = vst [vmem:[%s206_s7] sm:$0x3] %v303_v45 }
  0xd2   : > { %555 = shalt.err (!%p552_p13)
}
  0xd3   : > { %428 = dma.vmem_to_hbm [thread:$0]  (%p684_p9), %s322_s8, 32, %s324_s15, %s307_s9  }
  0xd4 PF: > { %s335_s11 = sand.u32 1, %s590_s12   ;;  %p435_p0 = pnand %p410_p12, %p691_p11 }
  0xd5   : > { %s336_s29 = scalar_lea.sflag [#allocation4], %s335_s11 }
  0xd6   : > { %p436_p1 = pneg %p435_p0 }
  0xd8   : > { %585 = dma.done.wait (%p436_p1), %s336_s29, 32  }
  0xd9   : > { %587 = vsyncadd (%p436_p1), %s336_s29, 4294967264  ;;  %s19_s17 = sadd.s32 1, %s610_s17   ;;  %s768_s12 = smov %s594_s13 }
  0xda   : > { %p16_p2 = scmp.ge.s32.totalorder %s19_s17, 4   ;;  %s769_s13 = smov %s598_s14 }
  0xdb   : > { %s770_s14 = smov %s689_s26  ;;  %s771_s15 = smov %s606_s16 }
  0xdc   : > { %s772_s16 = smov %s774_s20  ;;  %18 = sbr.rel (!%p16_p2) target bundleno = 6 (0x6), region = 77 }
  0xe1   :  { %342 = vsyncpa [#allocation3], 1 }
  0xe2   :  { %344 = vsyncpa [#allocation3 + $0x1], 1 }
  0xe3   :  { %345 = vsyncpa [#allocation4], 1 }
  0xe4   :  { %347 = vsyncpa [#allocation4 + $0x1], 1 }

</bundles_post_ra>
